<compile_context>
chip_gen: v7x
topology: tpu7x:2x2x1
jax: 0.10.0
libtpu: 0.0.40
codegen_flags: <defaults>
</compile_context>

<pallas_src>
import functools

import jax
import jax.numpy as jnp
from jax.experimental import pallas as pl
from jax.experimental.pallas import tpu as pltpu


def sublayer_connection_kernel(x_ref, w_ref, params_ref, *rest,
                               dropout_p, eps, use_dropout):
    if use_dropout:
        bits_ref, o_ref = rest
    else:
        (o_ref,) = rest

    # Keep MXU operands in their native dtype (bf16 stays bf16); accumulate f32.
    x_in = x_ref[...]                              # (tm, D)
    w = w_ref[...]                                 # (D, D)

    params = params_ref[...].astype(jnp.float32)   # (3, D): [bias; a; b]
    bias = params[0:1, :]
    a = params[1:2, :]
    b = params[2:3, :]

    # sublayer(x): Linear(D, D) on the MXU.
    y = jnp.dot(x_in, w, preferred_element_type=jnp.float32) + bias

    # Inverted dropout via integer threshold on pre-generated uint32 bits.
    if use_dropout:
        threshold = jnp.uint32(int((1.0 - dropout_p) * 4294967296.0))
        scale = jnp.float32(1.0 / (1.0 - dropout_p))
        keep = bits_ref[...] < threshold           # P(keep) = 1 - p
        y = jnp.where(keep, y * scale, jnp.float32(0.0))

    # Residual add + LayerNorm (unbiased std, eps added to std).
    z = x_in.astype(jnp.float32) + y
    d = z.shape[-1]
    mean = jnp.mean(z, axis=-1, keepdims=True)
    centered = z - mean
    var_unbiased = jnp.sum(centered * centered, axis=-1, keepdims=True) / (d - 1)
    std = jnp.sqrt(var_unbiased)
    inv = 1.0 / (std + eps)                        # (tm, 1): cheap per-row recip
    out = a * (centered * inv) + b                 # broadcast multiply, no (tm,D) divide
    o_ref[...] = out.astype(o_ref.dtype)


def sublayer_connection(x, w, bias, a, b, *, dropout_p=0.1, eps=1e-6,
                        train=True, rng_key=None, dropout_bits=None, tm=256):
    """x: (B, S, D); w: (D, D); bias/a/b: (1, D) or (D,). Returns (B, S, D)."""
    B, S, D = x.shape
    R = B * S
    xr = x.reshape(R, D)

    tm = min(int(tm), R)
    assert R % tm == 0, "B*S must be divisible by the row tile tm"
    assert tm % 8 == 0 or tm == R, "tm should be a multiple of the sublane quantum (8)"

    use_dropout = bool(train) and float(dropout_p) > 0.0

    params = jnp.concatenate(
        [jnp.reshape(bias, (1, D)), jnp.reshape(a, (1, D)), jnp.reshape(b, (1, D))],
        axis=0)                                    # (3, D) fused parameter block

    kern = functools.partial(
        sublayer_connection_kernel,
        dropout_p=float(dropout_p), eps=float(eps), use_dropout=use_dropout)

    in_specs = [
        pl.BlockSpec((tm, D), lambda i: (i, 0)),   # x row tile (pipelined)
        pl.BlockSpec((D, D), lambda i: (0, 0)),    # sublayer weight (resident)
        pl.BlockSpec((3, D), lambda i: (0, 0)),    # fused [bias; a; b] (resident)
    ]
    inputs = [xr, w, params]

    if use_dropout:
        if dropout_bits is None:
            if rng_key is None:
                rng_key = jax.random.PRNGKey(0)
            dropout_bits = jax.random.bits(rng_key, (R, D), dtype=jnp.uint32)
        bits = jnp.reshape(dropout_bits, (R, D)).astype(jnp.uint32)
        in_specs.append(pl.BlockSpec((tm, D), lambda i: (i, 0)))  # dropout bits
        inputs.append(bits)

    out = pl.pallas_call(
        kern,
        out_shape=jax.ShapeDtypeStruct((R, D), x.dtype),
        grid_spec=pltpu.PrefetchScalarGridSpec(
            num_scalar_prefetch=0,
            grid=(R // tm,),
            in_specs=in_specs,
            out_specs=pl.BlockSpec((tm, D), lambda i: (i, 0)),
        ),
        compiler_params=pltpu.CompilerParams(
            dimension_semantics=("parallel",)),    # row tiles are independent
    )(*inputs)
    return out.reshape(B, S, D)


def _reference(x, w, bias, a, b, *, dropout_p=0.0, dropout_bits=None, eps=1e-6):
    """Pure-JAX reference (dropout applied with the same bits/threshold)."""
    y = jnp.einsum("bsd,de->bse", x, w) + jnp.reshape(bias, (-1,))
    if dropout_bits is not None and dropout_p > 0.0:
        threshold = jnp.uint32(int((1.0 - dropout_p) * 4294967296.0))
        keep = jnp.reshape(dropout_bits, x.shape) < threshold
        y = jnp.where(keep, y * jnp.float32(1.0 / (1.0 - dropout_p)), 0.0)
    z = x + y
    d = z.shape[-1]
    mean = jnp.mean(z, axis=-1, keepdims=True)
    centered = z - mean
    std = jnp.sqrt(jnp.sum(centered * centered, axis=-1, keepdims=True) / (d - 1))
    return jnp.reshape(a, (-1,)) * (centered / (std + eps)) + jnp.reshape(b, (-1,))


if __name__ == "__main__":
    B, S, D = 2, 8, 32
    dropout_p = 0.1
    eps = 1e-6

    key = jax.random.PRNGKey(0)
    kx, kw, kb, kd = jax.random.split(key, 4)
    x = jax.random.normal(kx, (B, S, D), dtype=jnp.float32)

    # Deterministic parameter init (module __init__ shapes):
    #   LayerNorm: a = ones(dim), b = zeros(dim)
    #   sublayer Linear(dim, dim): small random W, bias
    w = jax.random.normal(kw, (D, D), dtype=jnp.float32) * 0.05
    bias = jax.random.normal(kb, (1, D), dtype=jnp.float32) * 0.05
    a = jnp.ones((1, D), dtype=jnp.float32)
    b = jnp.zeros((1, D), dtype=jnp.float32)

    # --- Eval mode (dropout identity); tm=8 -> 2 grid steps, exercises pipelining.
    out_eval = sublayer_connection(x, w, bias, a, b, dropout_p=dropout_p,
                                   eps=eps, train=False, tm=8)
    jax.block_until_ready(out_eval)
    ref_eval = _reference(x, w, bias, a, b, eps=eps)
    assert jnp.allclose(out_eval, ref_eval, atol=1e-5, rtol=1e-5), \
        "eval-mode mismatch vs reference"

    # --- Train mode: dropout bits generated once on host -> mask is independent
    #     of the tile size; verified against the pure-JAX reference with the
    #     same bits.
    bits = jax.random.bits(kd, (B * S, D), dtype=jnp.uint32)
    out_train = sublayer_connection(x, w, bias, a, b, dropout_p=dropout_p,
                                    eps=eps, train=True, dropout_bits=bits, tm=8)
    jax.block_until_ready(out_train)
    ref_train = _reference(x, w, bias, a, b, dropout_p=dropout_p,
                           dropout_bits=bits, eps=eps)
    assert jnp.allclose(out_train, ref_train, atol=1e-5, rtol=1e-5), \
        "train-mode mismatch vs reference"

    print("KERNEL_OK")
</pallas_src>

<mosaic_0001>
module attributes {stable_mosaic.version = 11 : i64} {
  func.func @sublayer_connection_kernel(%arg0: i32, %arg1: memref<8x32xf32, #tpu.memory_space<vmem>>, %arg2: memref<32x32xf32, #tpu.memory_space<vmem>>, %arg3: memref<3x32xf32, #tpu.memory_space<vmem>>, %arg4: memref<8x32xf32, #tpu.memory_space<vmem>>) attributes {dimension_semantics = [#tpu.dimension_semantics<parallel>], iteration_bounds = array<i64: 2>, scalar_prefetch = 0 : i64, scratch_operands = 0 : i64, tpu.core_type = #tpu.core_type<tc>, window_params = [{transform_indices = @transform_0, window_bounds = array<i64: 8, 32>}, {pipeline_mode = #tpu.pipeline_mode<synchronous>, transform_indices = @transform_1, window_bounds = array<i64: 32, 32>}, {pipeline_mode = #tpu.pipeline_mode<synchronous>, transform_indices = @transform_2, window_bounds = array<i64: 3, 32>}, {transform_indices = @transform_3, window_bounds = array<i64: 8, 32>}]} {
    %c0 = arith.constant 0 : index
    %c0_0 = arith.constant 0 : index
    %0 = vector.load %arg1[%c0, %c0_0] : memref<8x32xf32, #tpu.memory_space<vmem>>, vector<8x32xf32>
    %c0_1 = arith.constant 0 : index
    %c0_2 = arith.constant 0 : index
    %1 = vector.load %arg2[%c0_1, %c0_2] : memref<32x32xf32, #tpu.memory_space<vmem>>, vector<32x32xf32>
    %c0_3 = arith.constant 0 : index
    %c0_4 = arith.constant 0 : index
    %2 = vector.load %arg3[%c0_3, %c0_4] : memref<3x32xf32, #tpu.memory_space<vmem>>, vector<3x32xf32>
    %3 = vector.extract_strided_slice %2 {offsets = [0, 0], sizes = [1, 32], strides = [1, 1]} : vector<3x32xf32> to vector<1x32xf32>
    %4 = vector.extract_strided_slice %2 {offsets = [1, 0], sizes = [1, 32], strides = [1, 1]} : vector<3x32xf32> to vector<1x32xf32>
    %5 = vector.extract_strided_slice %2 {offsets = [2, 0], sizes = [1, 32], strides = [1, 1]} : vector<3x32xf32> to vector<1x32xf32>
    %cst = arith.constant dense<0.000000e+00> : vector<8x32xf32>
    %6 = tpu.matmul %0, %1, %cst {dimension_numbers = #tpu.dot_dimension_numbers<[1], [0], [0], [1], [0, 0, 1, 1], [], []>} : vector<8x32xf32>, vector<32x32xf32>, vector<8x32xf32> -> vector<8x32xf32>
    %7 = vector.broadcast %3 : vector<1x32xf32> to vector<8x32xf32>
    %8 = arith.addf %6, %7 : vector<8x32xf32>
    %9 = arith.addf %0, %8 : vector<8x32xf32>
    %cst_5 = arith.constant dense<0.000000e+00> : vector<8xf32>
    %10 = vector.multi_reduction <add>, %9, %cst_5 [1] : vector<8x32xf32> to vector<8xf32>
    %11 = vector.shape_cast %10 : vector<8xf32> to vector<8x1xf32>
    %cst_6 = arith.constant 3.200000e+01 : f32
    %12 = vector.broadcast %cst_6 : f32 to vector<8x1xf32>
    %13 = arith.divf %11, %12 : vector<8x1xf32>
    %14 = vector.broadcast %13 : vector<8x1xf32> to vector<8x32xf32>
    %15 = arith.subf %9, %14 : vector<8x32xf32>
    %16 = arith.mulf %15, %15 : vector<8x32xf32>
    %cst_7 = arith.constant dense<0.000000e+00> : vector<8xf32>
    %17 = vector.multi_reduction <add>, %16, %cst_7 [1] : vector<8x32xf32> to vector<8xf32>
    %18 = vector.shape_cast %17 : vector<8xf32> to vector<8x1xf32>
    %cst_8 = arith.constant 3.100000e+01 : f32
    %19 = vector.broadcast %cst_8 : f32 to vector<8x1xf32>
    %20 = arith.divf %18, %19 : vector<8x1xf32>
    %21 = math.sqrt %20 : vector<8x1xf32>
    %cst_9 = arith.constant 9.99999997E-7 : f32
    %22 = vector.broadcast %cst_9 : f32 to vector<8x1xf32>
    %23 = arith.addf %21, %22 : vector<8x1xf32>
    %cst_10 = arith.constant 1.000000e+00 : f32
    %24 = vector.broadcast %cst_10 : f32 to vector<8x1xf32>
    %25 = arith.divf %24, %23 : vector<8x1xf32>
    %26 = vector.broadcast %25 : vector<8x1xf32> to vector<8x32xf32>
    %27 = arith.mulf %15, %26 : vector<8x32xf32>
    %28 = vector.broadcast %4 : vector<1x32xf32> to vector<8x32xf32>
    %29 = arith.mulf %28, %27 : vector<8x32xf32>
    %30 = vector.broadcast %5 : vector<1x32xf32> to vector<8x32xf32>
    %31 = arith.addf %29, %30 : vector<8x32xf32>
    %c0_11 = arith.constant 0 : index
    %c0_12 = arith.constant 0 : index
    %32 = vector.load %arg4[%c0_11, %c0_12] : memref<8x32xf32, #tpu.memory_space<vmem>>, vector<8x32xf32>
    tpu.vector_store %arg4[%c0_11, %c0_12], %31 {strides = array<i32>} : memref<8x32xf32, #tpu.memory_space<vmem>>, vector<8x32xf32>,
    return
  }
  func.func @transform_0(%arg0: i32) -> (i32, i32) {
    %c0_i32 = arith.constant 0 : i32
    %c0_i32_0 = arith.constant 0 : i32
    return %arg0, %c0_i32 : i32, i32
  }
  func.func @transform_1(%arg0: i32) -> (i32, i32) {
    %c0_i32 = arith.constant 0 : i32
    %c0_i32_0 = arith.constant 0 : i32
    %c0_i32_1 = arith.constant 0 : i32
    return %c0_i32, %c0_i32_0 : i32, i32
  }
  func.func @transform_2(%arg0: i32) -> (i32, i32) {
    %c0_i32 = arith.constant 0 : i32
    %c0_i32_0 = arith.constant 0 : i32
    %c0_i32_1 = arith.constant 0 : i32
    return %c0_i32, %c0_i32_0 : i32, i32
  }
  func.func @transform_3(%arg0: i32) -> (i32, i32) {
    %c0_i32 = arith.constant 0 : i32
    %c0_i32_0 = arith.constant 0 : i32
    return %arg0, %c0_i32 : i32, i32
  }
}

</mosaic_0001>

<bundles_post_ra>
// kernel: tpu_custom_call.1
= control target key start
LH: loop header
LB: loop body
LE: loop exit
PB: predicated region body
PF: predicated region fallthrough
CT: control target
= control target key end

     0   :  { %8 = vsyncpa [#allocation3], 0  ;;  %s882_s0 = inlined_call_operand.hbm [shape: f32[16,32], index: 0, kind: input, shape index: {}]   ;;  %s883_s1 = inlined_call_operand.hbm [shape: f32[32,32], index: 1, kind: input, shape index: {}]   ;;  %s884_s2 = inlined_call_operand.vmem [shape: f32[3,32], index: 2, kind: input, shape index: {}]   ;;  %s885_s3 = inlined_call_operand.hbm [shape: f32[16,32], index: 3, kind: output, shape index: {}]  }
   0x1   :  { %10 = vsyncpa [#allocation3 + $0x1], 0 }
   0x2   :  { %11 = vsyncpa [#allocation6], 0 }
   0x3   :  { %12 = vsyncpa [#allocation4], 0 }
   0x4   :  { %14 = vsyncpa [#allocation4 + $0x1], 0  ;;  %s675_s12 = smov 0   ;;  %s677_s13 = smov 0  }
   0x5   :  { %s679_s14 = smov 0   ;;  %s681_s15 = smov 0  }
   0x6 LB: > { %s696_s16 = sadd.s32 4294967295, %s645_s15   ;;  %s414_s17 = sadd.s32 4294967294, %s645_s15   ;;  %s645_s15 = sphi %s681_s15, %s905_s15   ;;  %s641_s14 = sphi %s679_s14, %s904_s14   ;;  %s637_s13 = sphi %s677_s13, %s903_s13   ;;  %s633_s12 = sphi %s675_s12, %s902_s12  }
   0x7   : > { %p40_p0 = scmp.ne.s32.totalorder %s637_s13, %s633_s12  ;;  %p886_p1 = scmp.eq.s32.totalorder %s696_s16, 0 }
   0x8   : > { %p112_p3 = scmp.eq.s32.totalorder %s414_s17, 1  ;;  %p415_p5 = scmp.ge.s32.totalorder %s645_s15, 1 }
   0x9   : > { %p705_p4 = por %p886_p1, %p40_p0  ;;  %p119_p7 = scmp.lt.s32.totalorder %s645_s15, 3 }
   0xa   : > { %p710_p6 = por %p112_p3, %p40_p0  ;;  %s647_s21 = smov [#allocation5]  }
   0xb   : > { %s889_s18 = scalar_select %p705_p4, 1, 0 }
   0xc   : > { %s890_s19 = scalar_select %p710_p6, 1, 0 }
   0xd   : > { %p715_p8 = pnand %p415_p5, %p119_p7  ;;  %s131_s22 = sshll.u32 %s647_s21, 4  ;;  %s719_s22 = int_to_ptr.vmem [resolvable:$true] %s131_s22 }
   0xe   : > { %s731_s24 = sadd.s32 1, %s645_s15   ;;  %s27_s25 = sadd.s32 1, %s641_s14 }
   0xf   : > { %s891_s20 = scalar_select %p715_p8, 1, 0 }
  0x10   : > { %p459_p9 = pneg %p715_p8  ;;  %s24_s26 = ssub.s32 %s645_s15, %s731_s24 }
  0x11   : > { %s517_s29 = scalar_lea.hbm %s883_s1, 512 }
  0x12   : > { %p726_p11 = pnand %p459_p9, %p886_p1  ;;  %p518_p12 = scmp.ne.s32.totalorder %s883_s1, %s517_s29 }
  0x13   : > { %p524_p5 = scmp.lt.u32.totalorder %s517_s29, %s883_s1 }
  0x14   : > { %p519_p13 = pneg %p726_p11 }
  0x16   : > { %p520_p0 = pnand %p519_p13, %p518_p12 }
  0x18   : > { %p521_p3 = pneg %p520_p0 }
  0x1a   : > { %p526_p7 = pnand %p524_p5, %p521_p3 }
  0x1c   : > { %529 = shalt.err (!%p526_p7)
}
  0x1d   : > { %s530_s7 = scalar_lea.vmem %s719_s22, 512  ;;  %p538_p2 = scmp.lt.s32.totalorder %s719_s22, %s719_s22 }
  0x1e   : > { %p531_p9 = scmp.ne.s32.totalorder %s719_s22, %s530_s7  ;;  %p539_p6 = scmp.lt.s32.totalorder %s530_s7, %s530_s7 }
  0x20   : > { %p533_p10 = pnand %p531_p9, %p519_p13  ;;  %p540_p4 = por %p539_p6, %p538_p2 }
  0x22   : > { %p534_p1 = pneg %p533_p10 }
  0x24   : > { %p541_p8 = pnand %p540_p4, %p534_p1 }
  0x26   : > { %544 = shalt.err (!%p541_p8)
}
  0x27   : > { %s648_s8 = smov 128   ;;  %s649_s9 = smov 8  }
  0x28   : > { %462 = dma.hbm_to_vmem [thread:$0]  (!%p726_p11), %s883_s1, 512, %s719_s22, [#allocation6], %s648_s8, %s648_s8, %s649_s9  }
  0x29   : > { %p25_p2 = scmp.eq.s32.totalorder %s24_s26, 0  ;;  %p34_p1 = scmp.ne.s32.totalorder %s641_s14, %s637_s13 }
  0x2a   : > { %p35_p4 = scmp.eq.s32.totalorder %s645_s15, 0  ;;  %p472_p6 = scmp.lt.s32.totalorder %s645_s15, 2 }
  0x2b   : > { %s762_s17 = scalar_select %p25_p2, %s641_s14, %s27_s25  }
  0x2c   : > { %p36_p8 = por %p35_p4, %p34_p1  ;;  %p893_p10 = scmp.eq.s32.totalorder %s696_s16, 1 }
  0x2d   : > { %s148_s27 = sand.u32 1, %s641_s14   ;;  %s419_s28 = sshll.u32 %s645_s15, 7 }
  0x2e   : > { %p766_p12 = por %p893_p10, %p34_p1  ;;  %s418_s29 = sshll.u32 %s148_s27, 3 }
  0x2f   : > { %s775_s4 = scalar_lea.hbm %s882_s0, %s419_s28  ;;  %s152_s22 = scalar_lea.vmem [#allocation2], %s418_s29 }
  0x30   : > { %s159_s25 = sshll.u32 %s152_s22, 4  ;;  %p777_p11 = pnand %p472_p6, %p36_p8  ;;  %s781_s25 = int_to_ptr.vmem [resolvable:$true] %s159_s25 }
  0x31   : > { %s149_s5 = scalar_lea.sflag [#allocation3], %s148_s27  ;;  %s545_s6 = scalar_lea.hbm %s775_s4, 128 }
  0x32   : > { %p546_p13 = scmp.ne.s32.totalorder %s775_s4, %s545_s6  ;;  %p547_p0 = pneg %p777_p11 }
  0x33   : > { %s550_s9 = scalar_lea.hbm %s882_s0, 256  ;;  %p551_p7 = scmp.lt.u32.totalorder %s775_s4, %s882_s0 }
  0x34   : > { %p548_p3 = pnand %p547_p0, %p546_p13  ;;  %p552_p9 = scmp.lt.u32.totalorder %s550_s9, %s545_s6 }
  0x35   : > { %p554_p1 = scmp.lt.u32.totalorder %s545_s6, %s775_s4 }
  0x36   : > { %p549_p5 = pneg %p548_p3  ;;  %p553_p2 = por %p552_p9, %p551_p7 }
  0x38   : > { %p555_p4 = por %p554_p1, %p553_p2 }
  0x3a   : > { %p556_p6 = pnand %p555_p4, %p549_p5 }
  0x3c   : > { %559 = shalt.err (!%p556_p6)
}
  0x3d   : > { %s560_s27 = scalar_lea.vmem %s781_s25, 128  ;;  %s650_s28 = smov [#allocation2]  }
  0x3e   : > { %p561_p8 = scmp.ne.s32.totalorder %s781_s25, %s560_s27  ;;  %s565_s29 = sshll.u32 %s650_s28, 4  ;;  %s566_s29 = int_to_ptr.vmem [resolvable:$false] %s565_s29 }
  0x3f   : > { %s567_s23 = scalar_lea.vmem %s566_s29, 256  ;;  %p568_p3 = scmp.lt.s32.totalorder %s781_s25, %s566_s29 }
  0x40   : > { %p563_p10 = pnand %p561_p8, %p547_p0  ;;  %p569_p7 = scmp.lt.s32.totalorder %s567_s23, %s560_s27 }
  0x42   : > { %p564_p13 = pneg %p563_p10  ;;  %p570_p9 = por %p569_p7, %p568_p3 }
  0x44   : > { %p571_p2 = pnand %p570_p9, %p564_p13 }
  0x46   : > { %574 = shalt.err (!%p571_p2)
}
  0x47   : > { %466 = dma.hbm_to_vmem [thread:$0]  (!%p777_p11), %s775_s4, 128, %s781_s25, %s149_s5  }
  0x48   : > { %p896_p5 = scmp.ne.s32.totalorder %s891_s20, 0 }
  0x49   : > { %s811_s30 = sand.u32 (!%p896_p5), 1, %s637_s13   ;;  %p897_p0 = scmp.ne.s32.totalorder (!%p896_p5), %s889_s18, 0 }
  0x4a   : > { %168 = sbr.rel (%p896_p5) target bundleno = 653 (0x28d), region = 32  ;;  %s421_s22 = sshll.u32 (!%p896_p5), %s811_s30, 3 }
  0x4b   : > { %s171_s6 = scalar_lea.sflag (!%p896_p5), [#allocation3], %s811_s30  ;;  %s174_s7 = scalar_lea.vmem (!%p896_p5), [#allocation2], %s421_s22 }
  0x51   : > { %620 = dma.done.wait (%p897_p0), %s171_s6, 128  }
  0x52   : > { %622 = vsyncadd (%p897_p0), %s171_s6, 4294967168  ;;  %p898_p11 = scmp.eq.s32.totalorder %s696_s16, 0 }
  0x54   : > { %624 = dma.done.wait (%p898_p11), [#allocation6], 512   ;;  %p899_p1 = pmov %p898_p11 }
  0x55   : > { %v651_v0 = vmov 0.0|0.0   ;;  %vm652_vm0 = vmmov 0   ;;  %v653_v1 = vmov 0.0   ;;  %v202_v2 = vld [vmem:[#allocation5] sm:$0xff]  ;;  %v203_v3 = vld [vmem:[#allocation5 + $0x8] sm:$0xff]  ;;  %v204_v4 = vld [vmem:[#allocation5 + $0x10] sm:$0xff]  ;;  %v207_v9 = vlaneseq }
  0x56   : > { %626 = vsyncadd (%p899_p1), [#allocation6], 4294966784  ;;  %445 = vmatprep.subr.bf16.mxu0 %v651_v0  ;;  %442 = vmatprep.mubr.msk.f32.mxu0 %vm652_vm0, %v653_v1  ;;  %v446_v5 = vpack.c.bf16 %v203_v3, %v202_v2  ;;  %v205_v6 = vld [vmem:[#allocation5 + $0x18] sm:$0xff]  ;;  %vm211_vm1 = vcmask 261120   ;;  %v206_v12 = vld [vmem:[%s884_s2] sm:$0x7] }
  0x57   : > { %v449_v7 = vpack.c.bf16 %v205_v6, %v204_v4  ;;  %v201_v8 = vld [vmem:[%s174_s7] sm:$0xff]  ;;  %v208_v10 = vshrl.u32 %v207_v9, 7  ;;  %s426_s4 = sshll.u32 %s696_s16, 7  ;;  %s200_s25 = scalar_lea.vmem [#allocation7], %s421_s22 }
  0x58   : > { %447 = vmatpush3.bf16.msra.mxu0 %v446_v5  ;;  %s334_s26 = sshll.u32 %s200_s25, 4  ;;  %s837_s9 = scalar_lea.hbm %s885_s3, %s426_s4  ;;  %s839_s26 = int_to_ptr.vmem [resolvable:$true] %s334_s26 }
  0x59   : > { %448 = vmatprep.subr.bf16.mxu0 %v651_v0  ;;  %v209_v11 = vsub.s32 0, %v208_v10  ;;  %v311_v32 = vsub.s32 1, %v208_v10  ;;  %v316_v33 = vsub.s32 2, %v208_v10  ;;  %s321_s10 = scalar_lea.sflag [#allocation4], %s811_s30  ;;  %s575_s11 = scalar_lea.vmem %s839_s26, 128 }
  0x5a   : > { %p576_p4 = scmp.ne.s32.totalorder %s839_s26, %s575_s11  ;;  %s654_s16 = smov [#allocation7]  }
  0x5b   : > { %v210_v13 = vrot.slane %v206_v12, %v209_v11  ;;  %v312_v34 = vrot.slane %v206_v12, %v311_v32  ;;  %v317_v36 = vrot.slane %v206_v12, %v316_v33  ;;  %s579_s27 = sshll.u32 %s654_s16, 4  ;;  %s580_s27 = int_to_ptr.vmem [resolvable:$false] %s579_s27 }
  0x5c   : > { %450 = vmatpush3.bf16.msra.mxu0 %v449_v7  ;;  %p577_p6 = pnand %p576_p4, %p766_p12  ;;  %s581_s28 = scalar_lea.vmem %s580_s27, 256 }
  0x5d   : > { %p582_p10 = scmp.lt.s32.totalorder %s839_s26, %s580_s27  ;;  %p583_p13 = scmp.lt.s32.totalorder %s581_s28, %s575_s11 }
  0x5e   : > { %p578_p8 = pneg %p577_p6 }
  0x5f   : > { %443 = vmatmul.mubr.msk.f32.vlgmr.msra.gmra.mrb[0].mxu0 %vm211_vm1, %v201_v8  ;;  %p584_p3 = por %p583_p13, %p582_p10 }
  0x61   : > { %p585_p7 = pnand %p584_p3, %p578_p8 }
 0x132   : > { %v281_v14 = vpop.f32.mrb[0].mxu0 }
 0x133   : > { %v282_v15 = vadd.f32 %v281_v14, %v210_v13  ;;  %v444_v16 = vpop.f32.mrb[1].mxu0 }
 0x135   : > { %v285_v17 = vadd.f32 %v282_v15, %v201_v8 }
 0x137   : > { %v286_v18 = vsel %vm211_vm1, %v285_v17, 0.0 }
 0x138   : > { %287 = vadd.xlane.f32.xlu0 %v286_v18 }
 0x1c5   : > { %v288_v19 = vpop.xlane.xlu0 %287 }
 0x1c6   : > { %v290_v20 = vmul.f32 0.03125, %v288_v19 }
 0x1c8   : > { %v291_v21 = vsub.f32 %v285_v17, %v290_v20 }
 0x1ca   : > { %v292_v22 = vmul.f32 %v291_v21, %v291_v21 }
 0x1cc   : > { %v293_v23 = vsel %vm211_vm1, %v292_v22, 0.0 }
 0x1cd   : > { %294 = vadd.xlane.f32.xlu0 %v293_v23 }
 0x25a   : > { %v295_v24 = vpop.xlane.xlu0 %294 }
 0x25b   : > { %v297_v25 = vmul.f32 0.032258064, %v295_v24 }
 0x25d   : > { %513 = vrsqrt.f32 %v297_v25  ;;  %vm300_vm2 = vcmp.eq.f32.partialorder %v297_v25, inf  ;;  %v303_v28 = vand.u32 2147483648, %v297_v25  ;;  %vm302_vm3 = vcmp.eq.f32.partialorder %v297_v25, 0.0 }
 0x267   : > { %v514_v26 = vpop.eup %513 }
 0x268   : > { %v299_v27 = vmul.f32 %v514_v26, %v297_v25 }
 0x26a   : > { %v301_v29 = vsel %vm300_vm2, %v297_v25, %v299_v27 }
 0x26b   : > { %v304_v30 = vsel %vm302_vm3, %v303_v28, %v301_v29 }
 0x26c   : > { %v305_v31 = vadd.f32 1e-06, %v304_v30 }
 0x26e   : > { %515 = vrcp.f32 %v305_v31 }
 0x278   : > { %v516_v35 = vpop.eup %515 }
 0x279   : > { %v308_v37 = vmul.f32 %v516_v35, %v291_v21 }
 0x27b   : > { %v313_v38 = vmul.f32 %v312_v34, %v308_v37 }
 0x27d   : > { %v318_v39 = vadd.f32 %v317_v36, %v313_v38 }
 0x27f   : > { %319 = vst.msk [vmem:[%s200_s25] sm:$0xff] %vm211_vm1, %v318_v39 }
 0x280   : > { %588 = shalt.err (!%p585_p7)
}
 0x281   : > { %s589_s29 = scalar_lea.hbm %s837_s9, 128  ;;  %s593_s22 = scalar_lea.hbm %s885_s3, 256 }
 0x282   : > { %p590_p9 = scmp.ne.s32.totalorder %s837_s9, %s589_s29  ;;  %p594_p0 = scmp.lt.u32.totalorder %s837_s9, %s885_s3 }
 0x283   : > { %p595_p11 = scmp.lt.u32.totalorder %s593_s22, %s589_s29  ;;  %p597_p4 = scmp.lt.u32.totalorder %s589_s29, %s837_s9 }
 0x284   : > { %p591_p2 = pnand %p590_p9, %p766_p12 }
 0x285   : > { %p596_p1 = por %p595_p11, %p594_p0 }
 0x286   : > { %p592_p5 = pneg %p591_p2 }
 0x287   : > { %p598_p6 = por %p597_p4, %p596_p1 }
 0x289   : > { %p599_p8 = pnand %p598_p6, %p592_p5 }
 0x28b   : > { %602 = shalt.err (!%p599_p8)
}
 0x28c   : > { %457 = dma.vmem_to_hbm [thread:$0]  (%p766_p12), %s839_s26, 128, %s837_s9, %s321_s10  }
 0x28d PF: > { %s346_s18 = sand.u32 1, %s633_s12   ;;  %p900_p10 = scmp.ne.s32.totalorder %s890_s19, 0 }
 0x28e   : > { %p901_p13 = scmp.ge.s32.totalorder %s645_s15, 2  ;;  %s347_s20 = scalar_lea.sflag [#allocation4], %s346_s18 }
 0x290   : > { %p468_p3 = pnand %p901_p13, %p900_p10 }
 0x292   : > { %628 = dma.done.wait (!%p468_p3), %s347_s20, 128  }
 0x293   : > { %630 = vsyncadd (!%p468_p3), %s347_s20, 4294967168  ;;  %p17_p7 = scmp.ge.s32.totalorder %s731_s24, 4   ;;  %s902_s12 = smov %s637_s13 }
 0x294   : > { %s903_s13 = smov %s641_s14  ;;  %s904_s14 = smov %s762_s17 }
 0x295   : > { %s905_s15 = smov %s731_s24  ;;  %19 = sbr.rel (!%p17_p7) target bundleno = 6 (0x6), region = 81 }
 0x29c   :  { %352 = vsyncpa [#allocation3], 1 }
 0x29d   :  { %354 = vsyncpa [#allocation3 + $0x1], 1 }
 0x29e   :  { %355 = vsyncpa [#allocation6], 1 }
 0x29f   :  { %356 = vsyncpa [#allocation4], 1 }
 0x2a0   :  { %358 = vsyncpa [#allocation4 + $0x1], 1 }

</bundles_post_ra>
